<compile_context>
chip_gen: v7x
topology: tpu7x:2x2x1
jax: 0.10.0
libtpu: 0.0.40
codegen_flags: <defaults>
</compile_context>

<pallas_src>
import functools
import math

import jax
import jax.numpy as jnp
import numpy as np
from jax import lax
from jax.experimental import pallas as pl
from jax.experimental.pallas import tpu as pltpu

# Parameter order == iteration order of filtro_in.parameters in the PyTorch module.
PARAM_ORDER = ("f_inf", "f_start", "f_decay", "f_T", "w_offset", "w_T")
LIMITS = {
    "f_inf":    (0.001, 0.05),
    "f_start":  (0.05, 0.5),
    "f_decay":  (0.0, 2.0),
    "f_T":      (0.0, 1.0),
    "w_offset": (0.0, 1.0),
    "w_T":      (0.01, 0.5),
}
NORMAL_INIT = {
    "f_inf": 0.10, "f_start": -0.20, "f_decay": 0.30,
    "f_T": 0.00, "w_offset": -0.10, "w_T": 0.20,
}
_BN_EPS = 1e-5

LANES = 128        # lane width (fast batch axis)
SUB = 8            # sublane groups per grid program -> full (8, 128) vregs
T_BLOCK = 8        # timesteps per unrolled inner block (keeps block arrays ~8 vregs each)
T_CHUNK_MAX = 512  # timesteps per pipelined grid step (bounds VMEM independent of T)


def _round_up(x, m):
    return (x + m - 1) // m * m


# ----------------------------------------------------------------------------
# Pallas kernel: sequential cascaded one-pole IIR filter over time.
# Block views per (batch_program b, time_chunk t):
#   x_ref     : (t_chunk, sub, 128)   time-major, sublane-packed signal
#   p_ref     : (8, sub, 128)         rows 0..5 = squashed params (PARAM_ORDER), 6 = c
#   pred_ref  : (1, sub, 128)         written at the last time chunk
#   yplot_ref : (t_chunk, sub, 128)
#   scratch   : y0, y1, y2, acc, norm : (sub, 128) each, persistent across time chunks
# ----------------------------------------------------------------------------
def filter_feature_kernel(x_ref, p_ref, pred_ref, yplot_ref,
                          y0_s, y1_s, y2_s, acc_s, norm_s,
                          *, t_orig, t_chunk, t_block, mask_tail):
    tc = pl.program_id(1)
    num_blocks = t_chunk // t_block

    # Per-batch-element physical parameters: each a full (sub, 128) tile.
    f_inf   = p_ref[0]
    f_start = p_ref[1]
    f_decay = p_ref[2]
    f_tau   = p_ref[3]
    w_off   = p_ref[4]
    w_tau   = p_ref[5]
    c       = p_ref[6]

    # f(t_norm) = f_inf + (f_start - f_inf) * exp(t_norm * rate),
    # rate = log(0.7 * 0.1**f_decay) / (10 * 0.1**f_T)      (chunk prologue -> exact div ok)
    ln01 = jnp.float32(math.log(0.1))
    rate = (jnp.float32(math.log(0.7)) + f_decay * ln01) / (10.0 * jnp.exp(f_tau * ln01))
    df = f_start - f_inf
    inv_wtau = 1.0 / w_tau
    inv_T = jnp.float32(1.0 / t_orig)

    # Initialize carried state at the first time chunk.  Seeding y0=y1=y2=x[0] makes the
    # generic recurrence reproduce the t==0 special case exactly (since b=(a+1)/2),
    # removing all per-step selects from the serial chain.
    @pl.when(tc == 0)
    def _():
        x0 = x_ref[0]
        y0_s[...] = x0
        y1_s[...] = x0
        y2_s[...] = x0
        acc_s[...] = jnp.zeros_like(acc_s)
        norm_s[...] = jnp.zeros_like(norm_s)

    chunk_base = (tc * t_chunk).astype(jnp.float32)   # global timestep of this chunk
    t_orig_f = jnp.float32(t_orig)

    carry0 = (y0_s[...], y1_s[...], y2_s[...], acc_s[...], norm_s[...])

    def body(tb, carry):
        y0, y1, y2, acc, norm = carry
        t0 = tb * t_block
        base_t = chunk_base + t0.astype(jnp.float32)   # scalar: global time of block row 0

        # Per-timestep coefficients (independent of the carried state, so the scheduler
        # overlaps this EUP/VPU work with the serial chain).  All full (sub,128) vregs.
        a_rows, b_rows, w_rows = [], [], []
        for r in range(t_block):
            t_g = base_t + jnp.float32(r)
            t_norm = t_g * inv_T
            f_r = f_inf + df * jnp.exp(t_norm * rate)
            a_r = (f_r - c) * pl.reciprocal(f_r + c, approx=True)   # EUP approx recip
            w_r = jax.nn.sigmoid((t_norm - w_off) * inv_wtau)
            if mask_tail:
                # scalar-predicated select: zero w beyond the real sequence length
                w_r = jnp.where(t_g < t_orig_f, w_r, jnp.zeros_like(w_r))
            a_rows.append(a_r)
            b_rows.append((a_r + 1.0) * 0.5)
            w_rows.append(w_r)

        start = pl.multiple_of(t0, t_block)
        x_blk = x_ref[pl.ds(start, t_block), :, :]     # single (t_block, sub, 128) load

        # Serial cascaded one-pole recurrence (register-carried, full vregs per step).
        y2_rows = []
        for r in range(t_block):                        # static unroll
            xt, at, bt = x_blk[r], a_rows[r], b_rows[r]
            y1n = bt * (xt + y0) - at * y1
            y2n = bt * (y1n + y1) - at * y2
            y0, y1, y2 = xt, y1n, y2n
            y2_rows.append(y2n)

        # Weighted accumulation + normalization as block reductions, off the y-chain.
        y2_blk = jnp.stack(y2_rows, axis=0)             # (t_block, sub, 128)
        w_blk = jnp.stack(w_rows, axis=0)
        acc = acc + jnp.sum(w_blk * y2_blk, axis=0)
        norm = norm + jnp.sum(w_blk, axis=0)

        # Single lane-dense (t_block, sub, 128) store per block.
        yplot_ref[pl.ds(start, t_block), :, :] = y2_blk
        return (y0, y1, y2, acc, norm)

    y0, y1, y2, acc, norm = lax.fori_loop(0, num_blocks, body, carry0)

    y0_s[...] = y0
    y1_s[...] = y1
    y2_s[...] = y2
    acc_s[...] = acc
    norm_s[...] = norm

    @pl.when(tc == pl.num_programs(1) - 1)
    def _():
        pred_ref[0, :, :] = acc / norm   # exact divide: once per batch program


# ----------------------------------------------------------------------------
# Hoisted feature MLP (training-mode BatchNorm over the real batch) + sigmoid squash.
# features: (B, n_features) -> returns squashed physical params, shape (6, B).
# ----------------------------------------------------------------------------
def _feature_mlp(features, weights):
    def bn(h, g, be):
        mu = jnp.mean(h, axis=0)
        var = jnp.mean((h - mu) ** 2, axis=0)
        return (h - mu) * lax.rsqrt(var + _BN_EPS) * g + be

    h = bn(features, weights["g1"][:, 0], weights["be1"][:, 0])
    h = h @ weights["W1"].T + weights["b1"][:, 0]
    h = jnp.maximum(bn(h, weights["g2"][:, 0], weights["be2"][:, 0]), 0.0)
    h = h @ weights["W2"].T + weights["b2"][:, 0]
    h = jnp.maximum(bn(h, weights["g3"][:, 0], weights["be3"][:, 0]), 0.0)
    fc = h @ weights["W3"].T + weights["b3"][:, 0]                           # (B, 6)
    p = weights["lows"][:, 0] + (weights["highs"][:, 0] - weights["lows"][:, 0]) * \
        jax.nn.sigmoid(fc + weights["normals"][:, 0])                        # (B, 6)
    return p.T                                                               # (6, B)


def filter_feature_forward(X, features, F, weights, *,
                           t_block=T_BLOCK, t_chunk_max=T_CHUNK_MAX):
    """X: (B, T), features: (B, n_features), F: scalar.
    Returns (prediction (B,), y_plot (B, T))."""
    B, T = X.shape

    # ---- batch padding: 128-lane groups, sublane-packed into blocks of `sub` groups ----
    b_pad = max(_round_up(B, LANES), LANES)
    groups = b_pad // LANES
    if groups >= SUB:
        groups = _round_up(groups, SUB)
        sub = SUB                      # full (8,128) vregs per op
    else:
        sub = groups                   # small batch: block dim == full dim
    b_pad = groups * LANES
    num_b_progs = groups // sub        # >= 2 programs feed both v7x TensorCores when B>=2048

    # ---- time padding / chunking (bounds VMEM independent of T) ----
    t_chunk = min(_round_up(t_chunk_max, t_block), _round_up(T, t_block))
    t_pad = _round_up(T, t_chunk)
    num_t_chunks = t_pad // t_chunk
    mask_tail = (t_pad != T)

    # ---- plain-JAX MLP on the real batch (BN batch stats must not see padding) ----
    p = _feature_mlp(jnp.asarray(features, jnp.float32), weights)            # (6, B)
    # Edge-replicate padded lanes so padded columns stay finite (sliced away afterwards).
    p = jnp.pad(p, ((0, 0), (0, b_pad - B)), mode="edge")                    # (6, b_pad)
    c_val = jnp.float32((2.0 ** (1.0 / 3.0) - 1.0) ** 0.5 / math.pi) * \
        jnp.asarray(F, jnp.float32)
    p_packed = jnp.concatenate(
        [p,
         jnp.broadcast_to(c_val, (1, b_pad)).astype(jnp.float32),
         jnp.zeros((1, b_pad), jnp.float32)],
        axis=0).reshape(8, groups, LANES)                                    # (8, G, 128)

    # Time-major, sublane-packed signal.
    # TODO(synk): for HBM-bound v5e/v6e, fuse this transpose (and the output one) into the
    # kernel or return y_plot time-major to avoid two extra HBM passes.
    x_tb = jnp.pad(jnp.asarray(X, jnp.float32).T,
                   ((0, t_pad - T), (0, b_pad - B)))                         # (t_pad, b_pad)
    x_tb = x_tb.reshape(t_pad, groups, LANES)

    kernel = functools.partial(filter_feature_kernel, t_orig=T,
                               t_chunk=t_chunk, t_block=t_block,
                               mask_tail=mask_tail)

    # VMEM bound set by t_chunk (double-buffered x / y_plot chunks + params + scratch).
    row_bytes = 4 * sub * LANES
    vmem_est = (2 * 2 * t_chunk + 2 * 8 + 2 + 5) * row_bytes
    vmem_limit = int(min(max(32 * 2 ** 20, 2 * vmem_est), 56 * 2 ** 20))

    grid = (num_b_progs, num_t_chunks)
    pred_pad, yplot_pad = pl.pallas_call(
        kernel,
        out_shape=(jax.ShapeDtypeStruct((1, groups, LANES), jnp.float32),
                   jax.ShapeDtypeStruct((t_pad, groups, LANES), jnp.float32)),
        grid=grid,
        in_specs=[pl.BlockSpec((t_chunk, sub, LANES), lambda b, t: (t, b, 0)),
                  pl.BlockSpec((8, sub, LANES), lambda b, t: (0, b, 0))],
        out_specs=(pl.BlockSpec((1, sub, LANES), lambda b, t: (0, b, 0)),
                   pl.BlockSpec((t_chunk, sub, LANES), lambda b, t: (t, b, 0))),
        scratch_shapes=[pltpu.VMEM((sub, LANES), jnp.float32)] * 5,
        compiler_params=pltpu.CompilerParams(
            dimension_semantics=("parallel", "arbitrary"),
            vmem_limit_bytes=vmem_limit),
    )(x_tb, p_packed)

    pred = pred_pad.reshape(b_pad)[:B]
    y_plot = yplot_pad.reshape(t_pad, b_pad)[:T, :B].T
    return pred, y_plot


filter_feature_forward_jit = jax.jit(filter_feature_forward,
                                     static_argnames=("t_block", "t_chunk_max"))


def init_weights(key, n_features, n_hidden, n_param):
    """Deterministic synthetic parameters (shapes from Filter_feature.__init__)."""
    ks = jax.random.split(key, 3)

    def lin(k, out_d, in_d):
        kw, kb = jax.random.split(k)
        bound = 1.0 / math.sqrt(in_d)
        W = jax.random.uniform(kw, (out_d, in_d), jnp.float32, -bound, bound)
        b = jax.random.uniform(kb, (out_d, 1), jnp.float32, -bound, bound)
        return W, b

    W1, b1 = lin(ks[0], n_hidden, n_features)
    W2, b2 = lin(ks[1], n_hidden, n_hidden)
    W3, b3 = lin(ks[2], n_param, n_hidden)
    return dict(
        g1=jnp.ones((n_features, 1), jnp.float32),
        be1=jnp.zeros((n_features, 1), jnp.float32),
        W1=W1, b1=b1,
        g2=jnp.ones((n_hidden, 1), jnp.float32),
        be2=jnp.zeros((n_hidden, 1), jnp.float32),
        W2=W2, b2=b2,
        g3=jnp.ones((n_hidden, 1), jnp.float32),
        be3=jnp.zeros((n_hidden, 1), jnp.float32),
        W3=W3, b3=b3,
        normals=jnp.array([[NORMAL_INIT[p]] for p in PARAM_ORDER], jnp.float32),
        lows=jnp.array([[LIMITS[p][0]] for p in PARAM_ORDER], jnp.float32),
        highs=jnp.array([[LIMITS[p][1]] for p in PARAM_ORDER], jnp.float32),
    )


def reference_forward(X, features, F, weights):
    """Plain-JAX mirror of the PyTorch forward (batch-major), for verification."""
    B, T = X.shape

    def bn(h, g, be):
        mu = jnp.mean(h, axis=0)
        var = jnp.mean((h - mu) ** 2, axis=0)
        return (h - mu) / jnp.sqrt(var + _BN_EPS) * g + be

    h = bn(features, weights["g1"][:, 0], weights["be1"][:, 0])
    h = h @ weights["W1"].T + weights["b1"][:, 0]
    h = jnp.maximum(bn(h, weights["g2"][:, 0], weights["be2"][:, 0]), 0.0)
    h = h @ weights["W2"].T + weights["b2"][:, 0]
    h = jnp.maximum(bn(h, weights["g3"][:, 0], weights["be3"][:, 0]), 0.0)
    fc = h @ weights["W3"].T + weights["b3"][:, 0]                                   # (B, 6)

    p = weights["lows"][:, 0] + (weights["highs"][:, 0] - weights["lows"][:, 0]) * \
        jax.nn.sigmoid(fc + weights["normals"][:, 0])                                # (B, 6)
    f_inf, f_start, f_decay, f_T, w_off, w_T = [p[:, j:j + 1] for j in range(6)]

    t = jnp.arange(T, dtype=jnp.float32)[None, :] / T                                # (1, T)
    c = (2.0 ** (1.0 / 3.0) - 1.0) ** 0.5 * F / jnp.pi
    f = f_inf + (f_start - f_inf) * (0.7 * 0.1 ** f_decay) ** (t / (10.0 * 0.1 ** f_T))
    w = jax.nn.sigmoid((t - w_off) / w_T)                                            # (B, T)
    a = (f - c) / (f + c)
    b = (a + 1.0) / 2.0

    x0 = X[:, 0]

    def step(carry, inp):
        y0p, y1p, y2p, acc = carry
        xt, at, bt, wt = inp
        y1n = bt * (xt + y0p) - at * y1p
        y2n = bt * (y1n + y1p) - at * y2p
        return (xt, y1n, y2n, acc + wt * y2n), y2n

    init = (x0, x0, x0, w[:, 0] * x0)
    inputs = (X[:, 1:].T, a[:, 1:].T, b[:, 1:].T, w[:, 1:].T)
    (_, _, _, acc), ys = jax.lax.scan(step, init, inputs)
    pred = acc / jnp.sum(w, axis=1)
    y_plot = jnp.concatenate([x0[None, :], ys], axis=0).T
    return pred, y_plot


def _check(B, T, n_features=6, n_hidden=8, seed=0, **kw):
    key = jax.random.PRNGKey(seed)
    kx, kf, kw_ = jax.random.split(key, 3)
    X = jax.random.normal(kx, (B, T), jnp.float32)
    features = jax.random.normal(kf, (B, n_features), jnp.float32)
    F = 1.0
    weights = init_weights(kw_, n_features, n_hidden, len(PARAM_ORDER))

    pred, y_plot = filter_feature_forward_jit(X, features, F, weights, **kw)
    pred = jax.block_until_ready(pred)
    y_plot = jax.block_until_ready(y_plot)

    pred_ref, yplot_ref = reference_forward(X, features, F, weights)
    np.testing.assert_allclose(np.asarray(pred), np.asarray(pred_ref), rtol=5e-2, atol=5e-2)
    np.testing.assert_allclose(np.asarray(y_plot), np.asarray(yplot_ref), rtol=5e-2, atol=5e-2)


if __name__ == "__main__":
    # Small aligned case (single batch group, single time chunk).
    _check(B=4, T=16)
    # Ragged case (batch/time padding + tail masking).
    _check(B=5, T=12)
    # Multiple time chunks (exercises scratch-carried state across the "arbitrary" axis).
    _check(B=5, T=50, t_chunk_max=16)
    # Sublane-packed path: full (8,128) vregs, 2 parallel batch programs, ragged batch/time.
    _check(B=1037, T=40)
    print("KERNEL_OK")
</pallas_src>

<mosaic_0001>
module attributes {stable_mosaic.version = 11 : i64} {
  func.func @filter_feature_kernel(%arg0: i32, %arg1: i32, %arg2: memref<16x1x128xf32, #tpu.memory_space<vmem>>, %arg3: memref<8x1x128xf32, #tpu.memory_space<vmem>>, %arg4: memref<1x1x128xf32, #tpu.memory_space<vmem>>, %arg5: memref<16x1x128xf32, #tpu.memory_space<vmem>>, %arg6: memref<1x128xf32, #tpu.memory_space<vmem>>, %arg7: memref<1x128xf32, #tpu.memory_space<vmem>>, %arg8: memref<1x128xf32, #tpu.memory_space<vmem>>, %arg9: memref<1x128xf32, #tpu.memory_space<vmem>>, %arg10: memref<1x128xf32, #tpu.memory_space<vmem>>) attributes {dimension_semantics = [#tpu.dimension_semantics<parallel>, #tpu.dimension_semantics<arbitrary>], iteration_bounds = array<i64: 1, 1>, scalar_prefetch = 0 : i64, scratch_operands = 5 : i64, tpu.core_type = #tpu.core_type<tc>, window_params = [{transform_indices = @transform_0, window_bounds = array<i64: 16, 1, 128>}, {transform_indices = @transform_1, window_bounds = array<i64: 8, 1, 128>}, {transform_indices = @transform_2, window_bounds = array<i64: 1, 1, 128>}, {transform_indices = @transform_3, window_bounds = array<i64: 16, 1, 128>}]} {
    %c0 = arith.constant 0 : index
    %c0_0 = arith.constant 0 : index
    %c0_1 = arith.constant 0 : index
    %0 = vector.load %arg3[%c0, %c0_0, %c0_1] : memref<8x1x128xf32, #tpu.memory_space<vmem>>, vector<1x1x128xf32>
    %1 = vector.shape_cast %0 : vector<1x1x128xf32> to vector<1x128xf32>
    %c1 = arith.constant 1 : index
    %c0_2 = arith.constant 0 : index
    %c0_3 = arith.constant 0 : index
    %2 = vector.load %arg3[%c1, %c0_2, %c0_3] : memref<8x1x128xf32, #tpu.memory_space<vmem>>, vector<1x1x128xf32>
    %3 = vector.shape_cast %2 : vector<1x1x128xf32> to vector<1x128xf32>
    %c2 = arith.constant 2 : index
    %c0_4 = arith.constant 0 : index
    %c0_5 = arith.constant 0 : index
    %4 = vector.load %arg3[%c2, %c0_4, %c0_5] : memref<8x1x128xf32, #tpu.memory_space<vmem>>, vector<1x1x128xf32>
    %5 = vector.shape_cast %4 : vector<1x1x128xf32> to vector<1x128xf32>
    %c3 = arith.constant 3 : index
    %c0_6 = arith.constant 0 : index
    %c0_7 = arith.constant 0 : index
    %6 = vector.load %arg3[%c3, %c0_6, %c0_7] : memref<8x1x128xf32, #tpu.memory_space<vmem>>, vector<1x1x128xf32>
    %7 = vector.shape_cast %6 : vector<1x1x128xf32> to vector<1x128xf32>
    %c4 = arith.constant 4 : index
    %c0_8 = arith.constant 0 : index
    %c0_9 = arith.constant 0 : index
    %8 = vector.load %arg3[%c4, %c0_8, %c0_9] : memref<8x1x128xf32, #tpu.memory_space<vmem>>, vector<1x1x128xf32>
    %9 = vector.shape_cast %8 : vector<1x1x128xf32> to vector<1x128xf32>
    %c5 = arith.constant 5 : index
    %c0_10 = arith.constant 0 : index
    %c0_11 = arith.constant 0 : index
    %10 = vector.load %arg3[%c5, %c0_10, %c0_11] : memref<8x1x128xf32, #tpu.memory_space<vmem>>, vector<1x1x128xf32>
    %11 = vector.shape_cast %10 : vector<1x1x128xf32> to vector<1x128xf32>
    %c6 = arith.constant 6 : index
    %c0_12 = arith.constant 0 : index
    %c0_13 = arith.constant 0 : index
    %12 = vector.load %arg3[%c6, %c0_12, %c0_13] : memref<8x1x128xf32, #tpu.memory_space<vmem>>, vector<1x1x128xf32>
    %13 = vector.shape_cast %12 : vector<1x1x128xf32> to vector<1x128xf32>
    %cst = arith.constant -2.30258512 : f32
    %14 = vector.broadcast %cst : f32 to vector<1x128xf32>
    %15 = arith.mulf %5, %14 : vector<1x128xf32>
    %cst_14 = arith.constant -0.356674939 : f32
    %16 = vector.broadcast %cst_14 : f32 to vector<1x128xf32>
    %17 = arith.addf %16, %15 : vector<1x128xf32>
    %cst_15 = arith.constant -2.30258512 : f32
    %18 = vector.broadcast %cst_15 : f32 to vector<1x128xf32>
    %19 = arith.mulf %7, %18 : vector<1x128xf32>
    %20 = math.exp %19 : vector<1x128xf32>
    %cst_16 = arith.constant 1.000000e+01 : f32
    %21 = vector.broadcast %cst_16 : f32 to vector<1x128xf32>
    %22 = arith.mulf %21, %20 : vector<1x128xf32>
    %23 = arith.divf %17, %22 : vector<1x128xf32>
    %24 = arith.subf %3, %1 : vector<1x128xf32>
    %cst_17 = arith.constant 1.000000e+00 : f32
    %25 = vector.broadcast %cst_17 : f32 to vector<1x128xf32>
    %26 = arith.divf %25, %11 : vector<1x128xf32>
    %c0_i32 = arith.constant 0 : i32
    %27 = arith.cmpi eq, %arg1, %c0_i32 : i32
    %28 = arith.extui %27 : i1 to i32
    %c0_i32_18 = arith.constant 0 : i32
    %29 = arith.cmpi ne, %28, %c0_i32_18 : i32
    scf.if %29 {
      %c0_44 = arith.constant 0 : index
      %c0_45 = arith.constant 0 : index
      %c0_46 = arith.constant 0 : index
      %47 = vector.load %arg2[%c0_44, %c0_45, %c0_46] : memref<16x1x128xf32, #tpu.memory_space<vmem>>, vector<1x1x128xf32>
      %48 = vector.shape_cast %47 : vector<1x1x128xf32> to vector<1x128xf32>
      %c0_47 = arith.constant 0 : index
      %c0_48 = arith.constant 0 : index
      %49 = vector.load %arg6[%c0_47, %c0_48] : memref<1x128xf32, #tpu.memory_space<vmem>>, vector<1x128xf32>
      tpu.vector_store %arg6[%c0_47, %c0_48], %48 {strides = array<i32>} : memref<1x128xf32, #tpu.memory_space<vmem>>, vector<1x128xf32>,
      %c0_49 = arith.constant 0 : index
      %c0_50 = arith.constant 0 : index
      %50 = vector.load %arg7[%c0_49, %c0_50] : memref<1x128xf32, #tpu.memory_space<vmem>>, vector<1x128xf32>
      tpu.vector_store %arg7[%c0_49, %c0_50], %48 {strides = array<i32>} : memref<1x128xf32, #tpu.memory_space<vmem>>, vector<1x128xf32>,
      %c0_51 = arith.constant 0 : index
      %c0_52 = arith.constant 0 : index
      %51 = vector.load %arg8[%c0_51, %c0_52] : memref<1x128xf32, #tpu.memory_space<vmem>>, vector<1x128xf32>
      tpu.vector_store %arg8[%c0_51, %c0_52], %48 {strides = array<i32>} : memref<1x128xf32, #tpu.memory_space<vmem>>, vector<1x128xf32>,
      %cst_53 = arith.constant 0.000000e+00 : f32
      %52 = vector.broadcast %cst_53 : f32 to vector<1x128xf32>
      %c0_54 = arith.constant 0 : index
      %c0_55 = arith.constant 0 : index
      %53 = vector.load %arg9[%c0_54, %c0_55] : memref<1x128xf32, #tpu.memory_space<vmem>>, vector<1x128xf32>
      tpu.vector_store %arg9[%c0_54, %c0_55], %52 {strides = array<i32>} : memref<1x128xf32, #tpu.memory_space<vmem>>, vector<1x128xf32>,
      %cst_56 = arith.constant 0.000000e+00 : f32
      %54 = vector.broadcast %cst_56 : f32 to vector<1x128xf32>
      %c0_57 = arith.constant 0 : index
      %c0_58 = arith.constant 0 : index
      %55 = vector.load %arg10[%c0_57, %c0_58] : memref<1x128xf32, #tpu.memory_space<vmem>>, vector<1x128xf32>
      tpu.vector_store %arg10[%c0_57, %c0_58], %54 {strides = array<i32>} : memref<1x128xf32, #tpu.memory_space<vmem>>, vector<1x128xf32>,
    } else {
    }
    %c16_i32 = arith.constant 16 : i32
    %30 = arith.muli %arg1, %c16_i32 : i32
    %31 = arith.sitofp %30 : i32 to f32
    %c0_19 = arith.constant 0 : index
    %c0_20 = arith.constant 0 : index
    %32 = vector.load %arg6[%c0_19, %c0_20] : memref<1x128xf32, #tpu.memory_space<vmem>>, vector<1x128xf32>
    %c0_21 = arith.constant 0 : index
    %c0_22 = arith.constant 0 : index
    %33 = vector.load %arg7[%c0_21, %c0_22] : memref<1x128xf32, #tpu.memory_space<vmem>>, vector<1x128xf32>
    %c0_23 = arith.constant 0 : index
    %c0_24 = arith.constant 0 : index
    %34 = vector.load %arg8[%c0_23, %c0_24] : memref<1x128xf32, #tpu.memory_space<vmem>>, vector<1x128xf32>
    %c0_25 = arith.constant 0 : index
    %c0_26 = arith.constant 0 : index
    %35 = vector.load %arg9[%c0_25, %c0_26] : memref<1x128xf32, #tpu.memory_space<vmem>>, vector<1x128xf32>
    %c0_27 = arith.constant 0 : index
    %c0_28 = arith.constant 0 : index
    %36 = vector.load %arg10[%c0_27, %c0_28] : memref<1x128xf32, #tpu.memory_space<vmem>>, vector<1x128xf32>
    %cst_29 = arith.constant 6.250000e-02 : f32
    %c0_i32_30 = arith.constant 0 : i32
    %c2_i32 = arith.constant 2 : i32
    %37 = arith.addi %c0_i32_30, %c2_i32 : i32
    %c1_i32 = arith.constant 1 : i32
    %38:5 = scf.for %arg11 = %c0_i32_30 to %37 step %c1_i32 iter_args(%arg12 = %32, %arg13 = %33, %arg14 = %34, %arg15 = %35, %arg16 = %36) -> (vector<1x128xf32>, vector<1x128xf32>, vector<1x128xf32>, vector<1x128xf32>, vector<1x128xf32>)  : i32 {
      %c8_i32 = arith.constant 8 : i32
      %47 = arith.muli %arg11, %c8_i32 : i32
      %48 = arith.sitofp %47 : i32 to f32
      %49 = arith.addf %31, %48 : f32
      %cst_44 = arith.constant 0.000000e+00 : f32
      %50 = arith.addf %49, %cst_44 : f32
      %51 = arith.mulf %50, %cst_29 : f32
      %52 = vector.broadcast %51 : f32 to vector<1x128xf32>
      %53 = arith.mulf %52, %23 : vector<1x128xf32>
      %54 = math.exp %53 : vector<1x128xf32>
      %55 = arith.mulf %24, %54 : vector<1x128xf32>
      %56 = arith.addf %1, %55 : vector<1x128xf32>
      %57 = arith.subf %56, %13 : vector<1x128xf32>
      %58 = arith.addf %56, %13 : vector<1x128xf32>
      %59 = tpu.reciprocal %58 {approx = true} : vector<1x128xf32> -> vector<1x128xf32>
      %60 = arith.mulf %57, %59 : vector<1x128xf32>
      %61 = vector.broadcast %51 : f32 to vector<1x128xf32>
      %62 = arith.subf %61, %9 : vector<1x128xf32>
      %63 = arith.mulf %62, %26 : vector<1x128xf32>
      %64 = arith.negf %63 : vector<1x128xf32>
      %65 = math.exp %64 : vector<1x128xf32>
      %cst_45 = arith.constant 1.000000e+00 : f32
      %66 = vector.broadcast %cst_45 : f32 to vector<1x128xf32>
      %67 = arith.addf %66, %65 : vector<1x128xf32>
      %68 = arith.divf %66, %67 : vector<1x128xf32>
      %cst_46 = arith.constant 1.000000e+00 : f32
      %69 = vector.broadcast %cst_46 : f32 to vector<1x128xf32>
      %70 = arith.addf %60, %69 : vector<1x128xf32>
      %cst_47 = arith.constant 5.000000e-01 : f32
      %71 = vector.broadcast %cst_47 : f32 to vector<1x128xf32>
      %72 = arith.mulf %70, %71 : vector<1x128xf32>
      %cst_48 = arith.constant 1.000000e+00 : f32
      %73 = arith.addf %49, %cst_48 : f32
      %74 = arith.mulf %73, %cst_29 : f32
      %75 = vector.broadcast %74 : f32 to vector<1x128xf32>
      %76 = arith.mulf %75, %23 : vector<1x128xf32>
      %77 = math.exp %76 : vector<1x128xf32>
      %78 = arith.mulf %24, %77 : vector<1x128xf32>
      %79 = arith.addf %1, %78 : vector<1x128xf32>
      %80 = arith.subf %79, %13 : vector<1x128xf32>
      %81 = arith.addf %79, %13 : vector<1x128xf32>
      %82 = tpu.reciprocal %81 {approx = true} : vector<1x128xf32> -> vector<1x128xf32>
      %83 = arith.mulf %80, %82 : vector<1x128xf32>
      %84 = vector.broadcast %74 : f32 to vector<1x128xf32>
      %85 = arith.subf %84, %9 : vector<1x128xf32>
      %86 = arith.mulf %85, %26 : vector<1x128xf32>
      %87 = arith.negf %86 : vector<1x128xf32>
      %88 = math.exp %87 : vector<1x128xf32>
      %cst_49 = arith.constant 1.000000e+00 : f32
      %89 = vector.broadcast %cst_49 : f32 to vector<1x128xf32>
      %90 = arith.addf %89, %88 : vector<1x128xf32>
      %91 = arith.divf %89, %90 : vector<1x128xf32>
      %cst_50 = arith.constant 1.000000e+00 : f32
      %92 = vector.broadcast %cst_50 : f32 to vector<1x128xf32>
      %93 = arith.addf %83, %92 : vector<1x128xf32>
      %cst_51 = arith.constant 5.000000e-01 : f32
      %94 = vector.broadcast %cst_51 : f32 to vector<1x128xf32>
      %95 = arith.mulf %93, %94 : vector<1x128xf32>
      %cst_52 = arith.constant 2.000000e+00 : f32
      %96 = arith.addf %49, %cst_52 : f32
      %97 = arith.mulf %96, %cst_29 : f32
      %98 = vector.broadcast %97 : f32 to vector<1x128xf32>
      %99 = arith.mulf %98, %23 : vector<1x128xf32>
      %100 = math.exp %99 : vector<1x128xf32>
      %101 = arith.mulf %24, %100 : vector<1x128xf32>
      %102 = arith.addf %1, %101 : vector<1x128xf32>
      %103 = arith.subf %102, %13 : vector<1x128xf32>
      %104 = arith.addf %102, %13 : vector<1x128xf32>
      %105 = tpu.reciprocal %104 {approx = true} : vector<1x128xf32> -> vector<1x128xf32>
      %106 = arith.mulf %103, %105 : vector<1x128xf32>
      %107 = vector.broadcast %97 : f32 to vector<1x128xf32>
      %108 = arith.subf %107, %9 : vector<1x128xf32>
      %109 = arith.mulf %108, %26 : vector<1x128xf32>
      %110 = arith.negf %109 : vector<1x128xf32>
      %111 = math.exp %110 : vector<1x128xf32>
      %cst_53 = arith.constant 1.000000e+00 : f32
      %112 = vector.broadcast %cst_53 : f32 to vector<1x128xf32>
      %113 = arith.addf %112, %111 : vector<1x128xf32>
      %114 = arith.divf %112, %113 : vector<1x128xf32>
      %cst_54 = arith.constant 1.000000e+00 : f32
      %115 = vector.broadcast %cst_54 : f32 to vector<1x128xf32>
      %116 = arith.addf %106, %115 : vector<1x128xf32>
      %cst_55 = arith.constant 5.000000e-01 : f32
      %117 = vector.broadcast %cst_55 : f32 to vector<1x128xf32>
      %118 = arith.mulf %116, %117 : vector<1x128xf32>
      %cst_56 = arith.constant 3.000000e+00 : f32
      %119 = arith.addf %49, %cst_56 : f32
      %120 = arith.mulf %119, %cst_29 : f32
      %121 = vector.broadcast %120 : f32 to vector<1x128xf32>
      %122 = arith.mulf %121, %23 : vector<1x128xf32>
      %123 = math.exp %122 : vector<1x128xf32>
      %124 = arith.mulf %24, %123 : vector<1x128xf32>
      %125 = arith.addf %1, %124 : vector<1x128xf32>
      %126 = arith.subf %125, %13 : vector<1x128xf32>
      %127 = arith.addf %125, %13 : vector<1x128xf32>
      %128 = tpu.reciprocal %127 {approx = true} : vector<1x128xf32> -> vector<1x128xf32>
      %129 = arith.mulf %126, %128 : vector<1x128xf32>
      %130 = vector.broadcast %120 : f32 to vector<1x128xf32>
      %131 = arith.subf %130, %9 : vector<1x128xf32>
      %132 = arith.mulf %131, %26 : vector<1x128xf32>
      %133 = arith.negf %132 : vector<1x128xf32>
      %134 = math.exp %133 : vector<1x128xf32>
      %cst_57 = arith.constant 1.000000e+00 : f32
      %135 = vector.broadcast %cst_57 : f32 to vector<1x128xf32>
      %136 = arith.addf %135, %134 : vector<1x128xf32>
      %137 = arith.divf %135, %136 : vector<1x128xf32>
      %cst_58 = arith.constant 1.000000e+00 : f32
      %138 = vector.broadcast %cst_58 : f32 to vector<1x128xf32>
      %139 = arith.addf %129, %138 : vector<1x128xf32>
      %cst_59 = arith.constant 5.000000e-01 : f32
      %140 = vector.broadcast %cst_59 : f32 to vector<1x128xf32>
      %141 = arith.mulf %139, %140 : vector<1x128xf32>
      %cst_60 = arith.constant 4.000000e+00 : f32
      %142 = arith.addf %49, %cst_60 : f32
      %143 = arith.mulf %142, %cst_29 : f32
      %144 = vector.broadcast %143 : f32 to vector<1x128xf32>
      %145 = arith.mulf %144, %23 : vector<1x128xf32>
      %146 = math.exp %145 : vector<1x128xf32>
      %147 = arith.mulf %24, %146 : vector<1x128xf32>
      %148 = arith.addf %1, %147 : vector<1x128xf32>
      %149 = arith.subf %148, %13 : vector<1x128xf32>
      %150 = arith.addf %148, %13 : vector<1x128xf32>
      %151 = tpu.reciprocal %150 {approx = true} : vector<1x128xf32> -> vector<1x128xf32>
      %152 = arith.mulf %149, %151 : vector<1x128xf32>
      %153 = vector.broadcast %143 : f32 to vector<1x128xf32>
      %154 = arith.subf %153, %9 : vector<1x128xf32>
      %155 = arith.mulf %154, %26 : vector<1x128xf32>
      %156 = arith.negf %155 : vector<1x128xf32>
      %157 = math.exp %156 : vector<1x128xf32>
      %cst_61 = arith.constant 1.000000e+00 : f32
      %158 = vector.broadcast %cst_61 : f32 to vector<1x128xf32>
      %159 = arith.addf %158, %157 : vector<1x128xf32>
      %160 = arith.divf %158, %159 : vector<1x128xf32>
      %cst_62 = arith.constant 1.000000e+00 : f32
      %161 = vector.broadcast %cst_62 : f32 to vector<1x128xf32>
      %162 = arith.addf %152, %161 : vector<1x128xf32>
      %cst_63 = arith.constant 5.000000e-01 : f32
      %163 = vector.broadcast %cst_63 : f32 to vector<1x128xf32>
      %164 = arith.mulf %162, %163 : vector<1x128xf32>
      %cst_64 = arith.constant 5.000000e+00 : f32
      %165 = arith.addf %49, %cst_64 : f32
      %166 = arith.mulf %165, %cst_29 : f32
      %167 = vector.broadcast %166 : f32 to vector<1x128xf32>
      %168 = arith.mulf %167, %23 : vector<1x128xf32>
      %169 = math.exp %168 : vector<1x128xf32>
      %170 = arith.mulf %24, %169 : vector<1x128xf32>
      %171 = arith.addf %1, %170 : vector<1x128xf32>
      %172 = arith.subf %171, %13 : vector<1x128xf32>
      %173 = arith.addf %171, %13 : vector<1x128xf32>
      %174 = tpu.reciprocal %173 {approx = true} : vector<1x128xf32> -> vector<1x128xf32>
      %175 = arith.mulf %172, %174 : vector<1x128xf32>
      %176 = vector.broadcast %166 : f32 to vector<1x128xf32>
      %177 = arith.subf %176, %9 : vector<1x128xf32>
      %178 = arith.mulf %177, %26 : vector<1x128xf32>
      %179 = arith.negf %178 : vector<1x128xf32>
      %180 = math.exp %179 : vector<1x128xf32>
      %cst_65 = arith.constant 1.000000e+00 : f32
      %181 = vector.broadcast %cst_65 : f32 to vector<1x128xf32>
      %182 = arith.addf %181, %180 : vector<1x128xf32>
      %183 = arith.divf %181, %182 : vector<1x128xf32>
      %cst_66 = arith.constant 1.000000e+00 : f32
      %184 = vector.broadcast %cst_66 : f32 to vector<1x128xf32>
      %185 = arith.addf %175, %184 : vector<1x128xf32>
      %cst_67 = arith.constant 5.000000e-01 : f32
      %186 = vector.broadcast %cst_67 : f32 to vector<1x128xf32>
      %187 = arith.mulf %185, %186 : vector<1x128xf32>
      %cst_68 = arith.constant 6.000000e+00 : f32
      %188 = arith.addf %49, %cst_68 : f32
      %189 = arith.mulf %188, %cst_29 : f32
      %190 = vector.broadcast %189 : f32 to vector<1x128xf32>
      %191 = arith.mulf %190, %23 : vector<1x128xf32>
      %192 = math.exp %191 : vector<1x128xf32>
      %193 = arith.mulf %24, %192 : vector<1x128xf32>
      %194 = arith.addf %1, %193 : vector<1x128xf32>
      %195 = arith.subf %194, %13 : vector<1x128xf32>
      %196 = arith.addf %194, %13 : vector<1x128xf32>
      %197 = tpu.reciprocal %196 {approx = true} : vector<1x128xf32> -> vector<1x128xf32>
      %198 = arith.mulf %195, %197 : vector<1x128xf32>
      %199 = vector.broadcast %189 : f32 to vector<1x128xf32>
      %200 = arith.subf %199, %9 : vector<1x128xf32>
      %201 = arith.mulf %200, %26 : vector<1x128xf32>
      %202 = arith.negf %201 : vector<1x128xf32>
      %203 = math.exp %202 : vector<1x128xf32>
      %cst_69 = arith.constant 1.000000e+00 : f32
      %204 = vector.broadcast %cst_69 : f32 to vector<1x128xf32>
      %205 = arith.addf %204, %203 : vector<1x128xf32>
      %206 = arith.divf %204, %205 : vector<1x128xf32>
      %cst_70 = arith.constant 1.000000e+00 : f32
      %207 = vector.broadcast %cst_70 : f32 to vector<1x128xf32>
      %208 = arith.addf %198, %207 : vector<1x128xf32>
      %cst_71 = arith.constant 5.000000e-01 : f32
      %209 = vector.broadcast %cst_71 : f32 to vector<1x128xf32>
      %210 = arith.mulf %208, %209 : vector<1x128xf32>
      %cst_72 = arith.constant 7.000000e+00 : f32
      %211 = arith.addf %49, %cst_72 : f32
      %212 = arith.mulf %211, %cst_29 : f32
      %213 = vector.broadcast %212 : f32 to vector<1x128xf32>
      %214 = arith.mulf %213, %23 : vector<1x128xf32>
      %215 = math.exp %214 : vector<1x128xf32>
      %216 = arith.mulf %24, %215 : vector<1x128xf32>
      %217 = arith.addf %1, %216 : vector<1x128xf32>
      %218 = arith.subf %217, %13 : vector<1x128xf32>
      %219 = arith.addf %217, %13 : vector<1x128xf32>
      %220 = tpu.reciprocal %219 {approx = true} : vector<1x128xf32> -> vector<1x128xf32>
      %221 = arith.mulf %218, %220 : vector<1x128xf32>
      %222 = vector.broadcast %212 : f32 to vector<1x128xf32>
      %223 = arith.subf %222, %9 : vector<1x128xf32>
      %224 = arith.mulf %223, %26 : vector<1x128xf32>
      %225 = arith.negf %224 : vector<1x128xf32>
      %226 = math.exp %225 : vector<1x128xf32>
      %cst_73 = arith.constant 1.000000e+00 : f32
      %227 = vector.broadcast %cst_73 : f32 to vector<1x128xf32>
      %228 = arith.addf %227, %226 : vector<1x128xf32>
      %229 = arith.divf %227, %228 : vector<1x128xf32>
      %cst_74 = arith.constant 1.000000e+00 : f32
      %230 = vector.broadcast %cst_74 : f32 to vector<1x128xf32>
      %231 = arith.addf %221, %230 : vector<1x128xf32>
      %cst_75 = arith.constant 5.000000e-01 : f32
      %232 = vector.broadcast %cst_75 : f32 to vector<1x128xf32>
      %233 = arith.mulf %231, %232 : vector<1x128xf32>
      %234 = tpu.assume_multiple %47, 8 : i32
      %235 = arith.index_cast %234 : i32 to index
      %c0_76 = arith.constant 0 : index
      %c0_77 = arith.constant 0 : index
      %236 = vector.load %arg2[%235, %c0_76, %c0_77] : memref<16x1x128xf32, #tpu.memory_space<vmem>>, vector<8x1x128xf32>
      %237 = vector.extract_strided_slice %236 {offsets = [0, 0, 0], sizes = [1, 1, 128], strides = [1, 1, 1]} : vector<8x1x128xf32> to vector<1x1x128xf32>
      %238 = vector.shape_cast %237 : vector<1x1x128xf32> to vector<1x128xf32>
      %239 = arith.addf %238, %arg12 : vector<1x128xf32>
      %240 = arith.mulf %72, %239 : vector<1x128xf32>
      %241 = arith.mulf %60, %arg13 : vector<1x128xf32>
      %242 = arith.subf %240, %241 : vector<1x128xf32>
      %243 = arith.addf %242, %arg13 : vector<1x128xf32>
      %244 = arith.mulf %72, %243 : vector<1x128xf32>
      %245 = arith.mulf %60, %arg14 : vector<1x128xf32>
      %246 = arith.subf %244, %245 : vector<1x128xf32>
      %247 = vector.extract_strided_slice %236 {offsets = [1, 0, 0], sizes = [1, 1, 128], strides = [1, 1, 1]} : vector<8x1x128xf32> to vector<1x1x128xf32>
      %248 = vector.shape_cast %247 : vector<1x1x128xf32> to vector<1x128xf32>
      %249 = arith.addf %248, %238 : vector<1x128xf32>
      %250 = arith.mulf %95, %249 : vector<1x128xf32>
      %251 = arith.mulf %83, %242 : vector<1x128xf32>
      %252 = arith.subf %250, %251 : vector<1x128xf32>
      %253 = arith.addf %252, %242 : vector<1x128xf32>
      %254 = arith.mulf %95, %253 : vector<1x128xf32>
      %255 = arith.mulf %83, %246 : vector<1x128xf32>
      %256 = arith.subf %254, %255 : vector<1x128xf32>
      %257 = vector.extract_strided_slice %236 {offsets = [2, 0, 0], sizes = [1, 1, 128], strides = [1, 1, 1]} : vector<8x1x128xf32> to vector<1x1x128xf32>
      %258 = vector.shape_cast %257 : vector<1x1x128xf32> to vector<1x128xf32>
      %259 = arith.addf %258, %248 : vector<1x128xf32>
      %260 = arith.mulf %118, %259 : vector<1x128xf32>
      %261 = arith.mulf %106, %252 : vector<1x128xf32>
      %262 = arith.subf %260, %261 : vector<1x128xf32>
      %263 = arith.addf %262, %252 : vector<1x128xf32>
      %264 = arith.mulf %118, %263 : vector<1x128xf32>
      %265 = arith.mulf %106, %256 : vector<1x128xf32>
      %266 = arith.subf %264, %265 : vector<1x128xf32>
      %267 = vector.extract_strided_slice %236 {offsets = [3, 0, 0], sizes = [1, 1, 128], strides = [1, 1, 1]} : vector<8x1x128xf32> to vector<1x1x128xf32>
      %268 = vector.shape_cast %267 : vector<1x1x128xf32> to vector<1x128xf32>
      %269 = arith.addf %268, %258 : vector<1x128xf32>
      %270 = arith.mulf %141, %269 : vector<1x128xf32>
      %271 = arith.mulf %129, %262 : vector<1x128xf32>
      %272 = arith.subf %270, %271 : vector<1x128xf32>
      %273 = arith.addf %272, %262 : vector<1x128xf32>
      %274 = arith.mulf %141, %273 : vector<1x128xf32>
      %275 = arith.mulf %129, %266 : vector<1x128xf32>
      %276 = arith.subf %274, %275 : vector<1x128xf32>
      %277 = vector.extract_strided_slice %236 {offsets = [4, 0, 0], sizes = [1, 1, 128], strides = [1, 1, 1]} : vector<8x1x128xf32> to vector<1x1x128xf32>
      %278 = vector.shape_cast %277 : vector<1x1x128xf32> to vector<1x128xf32>
      %279 = arith.addf %278, %268 : vector<1x128xf32>
      %280 = arith.mulf %164, %279 : vector<1x128xf32>
      %281 = arith.mulf %152, %272 : vector<1x128xf32>
      %282 = arith.subf %280, %281 : vector<1x128xf32>
      %283 = arith.addf %282, %272 : vector<1x128xf32>
      %284 = arith.mulf %164, %283 : vector<1x128xf32>
      %285 = arith.mulf %152, %276 : vector<1x128xf32>
      %286 = arith.subf %284, %285 : vector<1x128xf32>
      %287 = vector.extract_strided_slice %236 {offsets = [5, 0, 0], sizes = [1, 1, 128], strides = [1, 1, 1]} : vector<8x1x128xf32> to vector<1x1x128xf32>
      %288 = vector.shape_cast %287 : vector<1x1x128xf32> to vector<1x128xf32>
      %289 = arith.addf %288, %278 : vector<1x128xf32>
      %290 = arith.mulf %187, %289 : vector<1x128xf32>
      %291 = arith.mulf %175, %282 : vector<1x128xf32>
      %292 = arith.subf %290, %291 : vector<1x128xf32>
      %293 = arith.addf %292, %282 : vector<1x128xf32>
      %294 = arith.mulf %187, %293 : vector<1x128xf32>
      %295 = arith.mulf %175, %286 : vector<1x128xf32>
      %296 = arith.subf %294, %295 : vector<1x128xf32>
      %297 = vector.extract_strided_slice %236 {offsets = [6, 0, 0], sizes = [1, 1, 128], strides = [1, 1, 1]} : vector<8x1x128xf32> to vector<1x1x128xf32>
      %298 = vector.shape_cast %297 : vector<1x1x128xf32> to vector<1x128xf32>
      %299 = arith.addf %298, %288 : vector<1x128xf32>
      %300 = arith.mulf %210, %299 : vector<1x128xf32>
      %301 = arith.mulf %198, %292 : vector<1x128xf32>
      %302 = arith.subf %300, %301 : vector<1x128xf32>
      %303 = arith.addf %302, %292 : vector<1x128xf32>
      %304 = arith.mulf %210, %303 : vector<1x128xf32>
      %305 = arith.mulf %198, %296 : vector<1x128xf32>
      %306 = arith.subf %304, %305 : vector<1x128xf32>
      %307 = vector.extract_strided_slice %236 {offsets = [7, 0, 0], sizes = [1, 1, 128], strides = [1, 1, 1]} : vector<8x1x128xf32> to vector<1x1x128xf32>
      %308 = vector.shape_cast %307 : vector<1x1x128xf32> to vector<1x128xf32>
      %309 = arith.addf %308, %298 : vector<1x128xf32>
      %310 = arith.mulf %233, %309 : vector<1x128xf32>
      %311 = arith.mulf %221, %302 : vector<1x128xf32>
      %312 = arith.subf %310, %311 : vector<1x128xf32>
      %313 = arith.addf %312, %302 : vector<1x128xf32>
      %314 = arith.mulf %233, %313 : vector<1x128xf32>
      %315 = arith.mulf %221, %306 : vector<1x128xf32>
      %316 = arith.subf %314, %315 : vector<1x128xf32>
      %317 = vector.shape_cast %246 : vector<1x128xf32> to vector<1x1x128xf32>
      %318 = vector.shape_cast %256 : vector<1x128xf32> to vector<1x1x128xf32>
      %319 = vector.shape_cast %266 : vector<1x128xf32> to vector<1x1x128xf32>
      %320 = vector.shape_cast %276 : vector<1x128xf32> to vector<1x1x128xf32>
      %321 = vector.shape_cast %286 : vector<1x128xf32> to vector<1x1x128xf32>
      %322 = vector.shape_cast %296 : vector<1x128xf32> to vector<1x1x128xf32>
      %323 = vector.shape_cast %306 : vector<1x128xf32> to vector<1x1x128xf32>
      %324 = vector.shape_cast %316 : vector<1x128xf32> to vector<1x1x128xf32>
      %325 = tpu.concatenate %317, %318, %319, %320, %321, %322, %323, %324 in 0 : vector<1x1x128xf32>, vector<1x1x128xf32>, vector<1x1x128xf32>, vector<1x1x128xf32>, vector<1x1x128xf32>, vector<1x1x128xf32>, vector<1x1x128xf32>, vector<1x1x128xf32> -> vector<8x1x128xf32>
      %326 = vector.shape_cast %68 : vector<1x128xf32> to vector<1x1x128xf32>
      %327 = vector.shape_cast %91 : vector<1x128xf32> to vector<1x1x128xf32>
      %328 = vector.shape_cast %114 : vector<1x128xf32> to vector<1x1x128xf32>
      %329 = vector.shape_cast %137 : vector<1x128xf32> to vector<1x1x128xf32>
      %330 = vector.shape_cast %160 : vector<1x128xf32> to vector<1x1x128xf32>
      %331 = vector.shape_cast %183 : vector<1x128xf32> to vector<1x1x128xf32>
      %332 = vector.shape_cast %206 : vector<1x128xf32> to vector<1x1x128xf32>
      %333 = vector.shape_cast %229 : vector<1x128xf32> to vector<1x1x128xf32>
      %334 = tpu.concatenate %326, %327, %328, %329, %330, %331, %332, %333 in 0 : vector<1x1x128xf32>, vector<1x1x128xf32>, vector<1x1x128xf32>, vector<1x1x128xf32>, vector<1x1x128xf32>, vector<1x1x128xf32>, vector<1x1x128xf32>, vector<1x1x128xf32> -> vector<8x1x128xf32>
      %335 = arith.mulf %334, %325 : vector<8x1x128xf32>
      %cst_78 = arith.constant dense<0.000000e+00> : vector<1x128xf32>
      %336 = vector.multi_reduction <add>, %335, %cst_78 [0] : vector<8x1x128xf32> to vector<1x128xf32>
      %337 = arith.addf %arg15, %336 : vector<1x128xf32>
      %cst_79 = arith.constant dense<0.000000e+00> : vector<1x128xf32>
      %338 = vector.multi_reduction <add>, %334, %cst_79 [0] : vector<8x1x128xf32> to vector<1x128xf32>
      %339 = arith.addf %arg16, %338 : vector<1x128xf32>
      %340 = arith.index_cast %234 : i32 to index
      %c0_80 = arith.constant 0 : index
      %c0_81 = arith.constant 0 : index
      %341 = vector.load %arg5[%340, %c0_80, %c0_81] : memref<16x1x128xf32, #tpu.memory_space<vmem>>, vector<8x1x128xf32>
      tpu.vector_store %arg5[%340, %c0_80, %c0_81], %325 {strides = array<i32>} : memref<16x1x128xf32, #tpu.memory_space<vmem>>, vector<8x1x128xf32>,
      scf.yield %308, %312, %316, %337, %339 : vector<1x128xf32>, vector<1x128xf32>, vector<1x128xf32>, vector<1x128xf32>, vector<1x128xf32>
    }
    %c2_i32_31 = arith.constant 2 : i32
    %c0_32 = arith.constant 0 : index
    %c0_33 = arith.constant 0 : index
    %39 = vector.load %arg6[%c0_32, %c0_33] : memref<1x128xf32, #tpu.memory_space<vmem>>, vector<1x128xf32>
    tpu.vector_store %arg6[%c0_32, %c0_33], %38#0 {strides = array<i32>} : memref<1x128xf32, #tpu.memory_space<vmem>>, vector<1x128xf32>,
    %c0_34 = arith.constant 0 : index
    %c0_35 = arith.constant 0 : index
    %40 = vector.load %arg7[%c0_34, %c0_35] : memref<1x128xf32, #tpu.memory_space<vmem>>, vector<1x128xf32>
    tpu.vector_store %arg7[%c0_34, %c0_35], %38#1 {strides = array<i32>} : memref<1x128xf32, #tpu.memory_space<vmem>>, vector<1x128xf32>,
    %c0_36 = arith.constant 0 : index
    %c0_37 = arith.constant 0 : index
    %41 = vector.load %arg8[%c0_36, %c0_37] : memref<1x128xf32, #tpu.memory_space<vmem>>, vector<1x128xf32>
    tpu.vector_store %arg8[%c0_36, %c0_37], %38#2 {strides = array<i32>} : memref<1x128xf32, #tpu.memory_space<vmem>>, vector<1x128xf32>,
    %c0_38 = arith.constant 0 : index
    %c0_39 = arith.constant 0 : index
    %42 = vector.load %arg9[%c0_38, %c0_39] : memref<1x128xf32, #tpu.memory_space<vmem>>, vector<1x128xf32>
    tpu.vector_store %arg9[%c0_38, %c0_39], %38#3 {strides = array<i32>} : memref<1x128xf32, #tpu.memory_space<vmem>>, vector<1x128xf32>,
    %c0_40 = arith.constant 0 : index
    %c0_41 = arith.constant 0 : index
    %43 = vector.load %arg10[%c0_40, %c0_41] : memref<1x128xf32, #tpu.memory_space<vmem>>, vector<1x128xf32>
    tpu.vector_store %arg10[%c0_40, %c0_41], %38#4 {strides = array<i32>} : memref<1x128xf32, #tpu.memory_space<vmem>>, vector<1x128xf32>,
    %c0_i32_42 = arith.constant 0 : i32
    %44 = arith.cmpi eq, %arg1, %c0_i32_42 : i32
    %45 = arith.extui %44 : i1 to i32
    %c0_i32_43 = arith.constant 0 : i32
    %46 = arith.cmpi ne, %45, %c0_i32_43 : i32
    scf.if %46 {
      %47 = arith.divf %38#3, %38#4 : vector<1x128xf32>
      %c0_44 = arith.constant 0 : index
      %c0_45 = arith.constant 0 : index
      %c0_46 = arith.constant 0 : index
      %48 = vector.load %arg4[%c0_44, %c0_45, %c0_46] : memref<1x1x128xf32, #tpu.memory_space<vmem>>, vector<1x1x128xf32>
      %49 = vector.shape_cast %48 : vector<1x1x128xf32> to vector<1x128xf32>
      %50 = vector.shape_cast %47 : vector<1x128xf32> to vector<1x1x128xf32>
      tpu.vector_store %arg4[%c0_44, %c0_45, %c0_46], %50 {strides = array<i32>} : memref<1x1x128xf32, #tpu.memory_space<vmem>>, vector<1x1x128xf32>,
    } else {
    }
    return
  }
  func.func @transform_0(%arg0: i32, %arg1: i32) -> (i32, i32, i32) {
    %c0_i32 = arith.constant 0 : i32
    %c0_i32_0 = arith.constant 0 : i32
    return %arg1, %arg0, %c0_i32 : i32, i32, i32
  }
  func.func @transform_1(%arg0: i32, %arg1: i32) -> (i32, i32, i32) {
    %c0_i32 = arith.constant 0 : i32
    %c0_i32_0 = arith.constant 0 : i32
    %c0_i32_1 = arith.constant 0 : i32
    return %c0_i32, %arg0, %c0_i32_0 : i32, i32, i32
  }
  func.func @transform_2(%arg0: i32, %arg1: i32) -> (i32, i32, i32) {
    %c0_i32 = arith.constant 0 : i32
    %c0_i32_0 = arith.constant 0 : i32
    %c0_i32_1 = arith.constant 0 : i32
    return %c0_i32, %arg0, %c0_i32_0 : i32, i32, i32
  }
  func.func @transform_3(%arg0: i32, %arg1: i32) -> (i32, i32, i32) {
    %c0_i32 = arith.constant 0 : i32
    %c0_i32_0 = arith.constant 0 : i32
    return %arg1, %arg0, %c0_i32 : i32, i32, i32
  }
}

</mosaic_0001>

<bundles_post_ra>
// kernel: filter_feature_forward.1
= control target key start
LH: loop header
LB: loop body
LE: loop exit
PB: predicated region body
PF: predicated region fallthrough
CT: control target
= control target key end

     0   :  { %v594_v2 = vmov 0.0   ;;  %s662_s28 = smov 0   ;;  %s924_s1 = inlined_call_operand.vmem [shape: f32[8,1,128], index: 1, kind: input, shape index: {}]   ;;  %s925_s2 = inlined_call_operand.vmem [shape: f32[1,1,128], index: 2, kind: output, shape index: {0}]   ;;  %s926_s3 = inlined_call_operand.vmem [shape: f32[16,1,128], index: 3, kind: output, shape index: {1}]   ;;  %s927_s0 = inlined_call_operand.vmem [shape: f32[16,1,128], index: 0, kind: input, shape index: {}]  }
   0x1   :  { %v618_v0 = vld [vmem:[%s924_s1] sm:$0x1]  ;;  %v410_v1 = vld [vmem:[%s924_s1 + $0x1] sm:$0x1]  ;;  %45 = vst [vmem:[#allocation5] sm:$0x1] %v594_v2 }
   0x2   :  { %46 = vst [vmem:[#allocation6] sm:$0x1] %v594_v2  ;;  %v412_v3 = vld [vmem:[%s924_s1 + $0x3] sm:$0x1]  ;;  %v629_v4 = vld [vmem:[%s924_s1 + $0x4] sm:$0x1]  ;;  %v635_v6 = vsub.f32 %v410_v1, %v618_v0 }
   0x3   :  { %v414_v5 = vld [vmem:[%s924_s1 + $0x5] sm:$0x1]  ;;  %v640_v7 = vld [vmem:[%s924_s1 + $0x6] sm:$0x1]  ;;  %v28_v8 = vmul.f32 -2.3025851, %v412_v3 }
   0x4   :  { %474 = vrcp.f32 %v414_v5  ;;  %v41_v9 = vld [vmem:[%s927_s0] sm:$0x1]  ;;  %v411_v19 = vld [vmem:[%s924_s1 + $0x2] sm:$0x1] }
   0x5   :  { %v29_v10 = vmul.f32 1.442695, %v28_v8  ;;  %42 = vst [vmem:[#allocation2] sm:$0x1] %v41_v9  ;;  %43 = vst [vmem:[#allocation3] sm:$0x1] %v41_v9 }
   0x6   :  { %44 = vst [vmem:[#allocation4] sm:$0x1] %v41_v9  ;;  %v26_v20 = vmul.f32 -2.3025851, %v411_v19 }
   0x7   :  { %476 = vpow2.f32 %v29_v10 }
   0x8   :  { %v52_v11 = vld [vmem:[#allocation5] sm:$0x1]   ;;  %v27_v21 = vadd.f32 -0.35667494, %v26_v20 }
   0x9   :  { %v53_v12 = vld [vmem:[#allocation6] sm:$0x1]  }
   0xc   :  { %v49_v13 = vld [vmem:[#allocation2] sm:$0x1]   ;;  %v50_v14 = vld [vmem:[#allocation3] sm:$0x1]  }
   0xd   :  { %v51_v15 = vld [vmem:[#allocation4] sm:$0x1]  }
   0xe   :  { %v645_v16 = vpop.eup %474 }
  0x11   :  { %v477_v17 = vpop.eup %476 }
  0x12   :  { %v31_v18 = vmul.f32 10.0, %v477_v17 }
  0x14   :  { %478 = vrcp.f32 %v31_v18 }
  0x1e   :  { %v479_v22 = vpop.eup %478 }
  0x1f   :  { %v650_v23 = vmul.f32 %v479_v22, %v27_v21 }
  0x20 LB: > { %s683_s1 = sshll.u32 %s592_s28, 3  ;;  %vm325_vm0 = vcmask 1040384   ;;  %s59_s28 = sadd.s32 1, %s592_s28   ;;  %s592_s28 = sphi %s662_s28, %s59_s28   ;;  %v588_v13 = vphi %v49_v13, %v933_v13   ;;  %v584_v14 = vphi %v50_v14, %v932_v14   ;;  %v580_v15 = vphi %v51_v15, %v931_v15   ;;  %v576_v11 = vphi %v52_v11, %v930_v11   ;;  %v572_v12 = vphi %v53_v12, %v929_v12  }
  0x21   : > { %s686_s29 = scvt.s32.f32 %s683_s1  ;;  %s741_s20 = scalar_lea.vmem %s927_s0, %s683_s1 }
  0x22   : > { %s847_s23 = scalar_lea.vmem %s926_s3, %s683_s1  ;;  %p56_p0 = scmp.ge.s32.totalorder %s59_s28, 2  }
  0x23   : > { %s69_s30 = smul.f32 0.0625, %s686_s29  ;;  %s90_s4 = sadd.f32 1.0, %s686_s29 }
  0x24   : > { %s112_s5 = sadd.f32 2.0, %s686_s29 }
  0x25   : > { %v70_v24 = vstv %s69_s30  ;;  %s91_s6 = smul.f32 0.0625, %s90_s4  ;;  %s134_s7 = sadd.f32 3.0, %s686_s29 }
  0x26   : > { %v71_v25 = vmul.f32 %v70_v24, %v650_v23  ;;  %v80_v26 = vsub.f32 %v70_v24, %v629_v4  ;;  %s113_s8 = smul.f32 0.0625, %s112_s5  ;;  %s156_s9 = sadd.f32 4.0, %s686_s29 }
  0x27   : > { %v92_v27 = vstv %s91_s6  ;;  %s135_s10 = smul.f32 0.0625, %s134_s7  ;;  %s178_s11 = sadd.f32 5.0, %s686_s29 }
  0x28   : > { %v72_v28 = vmul.f32 1.442695, %v71_v25  ;;  %v81_v29 = vmul.f32 %v645_v16, %v80_v26  ;;  %v93_v30 = vmul.f32 %v92_v27, %v650_v23  ;;  %v102_v31 = vsub.f32 %v92_v27, %v629_v4  ;;  %s157_s12 = smul.f32 0.0625, %s156_s9  ;;  %s200_s14 = sadd.f32 6.0, %s686_s29 }
  0x29   : > { %v114_v32 = vstv %s113_s8  ;;  %v136_v33 = vstv %s135_s10  ;;  %s179_s13 = smul.f32 0.0625, %s178_s11  ;;  %s222_s15 = sadd.f32 7.0, %s686_s29 }
  0x2a   : > { %480 = vpow2.f32 %v72_v28  ;;  %v417_v34 = vmul.f32 -1.442695, %v81_v29  ;;  %v94_v35 = vmul.f32 1.442695, %v93_v30  ;;  %v103_v36 = vmul.f32 %v645_v16, %v102_v31  ;;  %s201_s16 = smul.f32 0.0625, %s200_s14 }
  0x2b   : > { %v115_v37 = vmul.f32 %v114_v32, %v650_v23  ;;  %v124_v38 = vsub.f32 %v114_v32, %v629_v4  ;;  %v137_v39 = vmul.f32 %v136_v33, %v650_v23  ;;  %v146_v40 = vsub.f32 %v136_v33, %v629_v4  ;;  %s223_s17 = smul.f32 0.0625, %s222_s15 }
  0x2c   : > { %482 = vpow2.f32 %v417_v34  ;;  %v418_v41 = vmul.f32 -1.442695, %v103_v36  ;;  %v158_v42 = vstv %s157_s12  ;;  %v180_v43 = vstv %s179_s13 }
  0x2d   : > { %484 = vpow2.f32 %v94_v35  ;;  %v116_v44 = vmul.f32 1.442695, %v115_v37  ;;  %v125_v45 = vmul.f32 %v645_v16, %v124_v38  ;;  %v138_v46 = vmul.f32 1.442695, %v137_v39 }
  0x2e   : > { %486 = vpow2.f32 %v418_v41  ;;  %v147_v47 = vmul.f32 %v645_v16, %v146_v40  ;;  %v159_v48 = vmul.f32 %v158_v42, %v650_v23  ;;  %v168_v49 = vsub.f32 %v158_v42, %v629_v4 }
  0x2f   : > { %488 = vpow2.f32 %v116_v44  ;;  %v419_v50 = vmul.f32 -1.442695, %v125_v45  ;;  %v181_v51 = vmul.f32 %v180_v43, %v650_v23  ;;  %v190_v52 = vsub.f32 %v180_v43, %v629_v4 }
  0x30   : > { %490 = vpow2.f32 %v138_v46  ;;  %v420_v53 = vmul.f32 -1.442695, %v147_v47  ;;  %v160_v54 = vmul.f32 1.442695, %v159_v48  ;;  %v169_v55 = vmul.f32 %v645_v16, %v168_v49  ;;  %v245_v49 = vld [vmem:[%s741_s20] sm:$0x1] }
  0x31   : > { %492 = vpow2.f32 %v419_v50  ;;  %v182_v56 = vmul.f32 1.442695, %v181_v51  ;;  %v191_v57 = vmul.f32 %v645_v16, %v190_v52  ;;  %v202_v58 = vstv %s201_s16 }
  0x32   : > { %494 = vpow2.f32 %v420_v53  ;;  %v421_v59 = vmul.f32 -1.442695, %v169_v55  ;;  %v203_v60 = vmul.f32 %v202_v58, %v650_v23  ;;  %v212_v61 = vsub.f32 %v202_v58, %v629_v4 }
  0x33   : > { %496 = vpow2.f32 %v160_v54  ;;  %v422_v62 = vmul.f32 -1.442695, %v191_v57  ;;  %v224_v63 = vstv %s223_s17 }
  0x34   : > { %v481_v1 = vpop.eup %480  ;;  %498 = vpow2.f32 %v421_v59  ;;  %v204_v2 = vmul.f32 1.442695, %v203_v60  ;;  %v213_v3 = vmul.f32 %v645_v16, %v212_v61  ;;  %v225_v5 = vmul.f32 %v224_v63, %v650_v23  ;;  %v246_v60 = vld [vmem:[%s741_s20 + $0x1] sm:$0x1]  ;;  %v247_v61 = vld [vmem:[%s741_s20 + $0x2] sm:$0x1] }
  0x35   : > { %v74_v8 = vmul.f32 %v481_v1, %v635_v6  ;;  %500 = vpow2.f32 %v182_v56  ;;  %v234_v9 = vsub.f32 %v224_v63, %v629_v4  ;;  %v253_v59 = vadd.f32 %v588_v13, %v245_v49 }
  0x36   : > { %v483_v10 = vpop.eup %482  ;;  %502 = vpow2.f32 %v422_v62  ;;  %v423_v17 = vmul.f32 -1.442695, %v213_v3  ;;  %v226_v18 = vmul.f32 1.442695, %v225_v5 }
  0x37   : > { %v485_v19 = vpop.eup %484  ;;  %v721_v20 = vadd.f32 %v74_v8, %v618_v0  ;;  %v85_v21 = vadd.f32 1.0, %v483_v10  ;;  %504 = vpow2.f32 %v204_v2  ;;  %v235_v22 = vmul.f32 %v645_v16, %v234_v9  ;;  %v772_v2 = vld [vmem:[%s741_s20 + $0x3] sm:$0x1] }
  0x38   : > { %v487_v24 = vpop.eup %486  ;;  %v96_v25 = vmul.f32 %v485_v19, %v635_v6  ;;  %506 = vpow2.f32 %v423_v17  ;;  %v261_v19 = vadd.f32 %v246_v60, %v245_v49 }
  0x39   : > { %v489_v26 = vpop.eup %488  ;;  %v77_v27 = vadd.f32 %v640_v7, %v721_v20  ;;  %508 = vrcp.f32 %v85_v21  ;;  %v107_v28 = vadd.f32 1.0, %v487_v24  ;;  %v424_v32 = vmul.f32 -1.442695, %v235_v22 }
  0x3a   : > { %v491_v29 = vpop.eup %490  ;;  %v728_v30 = vadd.f32 %v96_v25, %v618_v0  ;;  %v118_v31 = vmul.f32 %v489_v26, %v635_v6  ;;  %510 = vpow2.f32 %v226_v18  ;;  %v76_v55 = vsub.f32 %v721_v20, %v640_v7 }
  0x3b   : > { %v493_v33 = vpop.eup %492  ;;  %512 = vrcp.f32 %v77_v27  ;;  %v140_v34 = vmul.f32 %v491_v29, %v635_v6  ;;  %v269_v20 = vadd.f32 %v247_v61, %v246_v60  ;;  %v789_v25 = vadd.f32 %v772_v2, %v247_v61 }
  0x3c   : > { %v495_v35 = vpop.eup %494  ;;  %v99_v36 = vadd.f32 %v640_v7, %v728_v30  ;;  %514 = vrcp.f32 %v107_v28  ;;  %v735_v37 = vadd.f32 %v118_v31, %v618_v0  ;;  %v129_v39 = vadd.f32 1.0, %v493_v33 }
  0x3d   : > { %v497_v38 = vpop.eup %496  ;;  %v744_v40 = vadd.f32 %v140_v34, %v618_v0  ;;  %516 = vpow2.f32 %v424_v32  ;;  %v151_v43 = vadd.f32 1.0, %v495_v35  ;;  %v98_v1 = vsub.f32 %v728_v30, %v640_v7 }
  0x3e   : > { %v499_v41 = vpop.eup %498  ;;  %518 = vrcp.f32 %v99_v36  ;;  %v121_v42 = vadd.f32 %v640_v7, %v735_v37  ;;  %v162_v44 = vmul.f32 %v497_v38, %v635_v6  ;;  %v120_v24 = vsub.f32 %v735_v37, %v640_v7 }
  0x3f   : > { %v501_v45 = vpop.eup %500  ;;  %520 = vrcp.f32 %v129_v39  ;;  %v143_v46 = vadd.f32 %v640_v7, %v744_v40  ;;  %v173_v47 = vadd.f32 1.0, %v499_v41  ;;  %v142_v30 = vsub.f32 %v744_v40, %v640_v7 }
  0x40   : > { %v503_v48 = vpop.eup %502  ;;  %522 = vrcp.f32 %v121_v42  ;;  %v753_v50 = vadd.f32 %v162_v44, %v618_v0  ;;  %v184_v51 = vmul.f32 %v501_v45, %v635_v6 }
  0x41   : > { %v505_v52 = vpop.eup %504  ;;  %524 = vrcp.f32 %v143_v46  ;;  %v195_v53 = vadd.f32 1.0, %v503_v48 }
  0x42   : > { %v507_v54 = vpop.eup %506  ;;  %526 = vrcp.f32 %v151_v43  ;;  %v165_v56 = vadd.f32 %v640_v7, %v753_v50  ;;  %v761_v57 = vadd.f32 %v184_v51, %v618_v0  ;;  %v206_v62 = vmul.f32 %v505_v52, %v635_v6 }
  0x43   : > { %v763_v58 = vpop.eup %508  ;;  %528 = vrcp.f32 %v173_v47  ;;  %v217_v5 = vadd.f32 1.0, %v507_v54  ;;  %v164_v39 = vsub.f32 %v753_v50, %v640_v7 }
  0x44   : > { %v511_v63 = vpop.eup %510  ;;  %530 = vrcp.f32 %v165_v56  ;;  %v187_v3 = vadd.f32 %v640_v7, %v761_v57  ;;  %v342_v13 = vsel %vm325_vm0, %v763_v58, 0.0  ;;  %v779_v9 = vadd.f32 %v206_v62, %v618_v0 }
  0x45   : > { %v513_v8 = vpop.eup %512  ;;  %532 = vrcp.f32 %v195_v53  ;;  %v228_v10 = vmul.f32 %v511_v63, %v635_v6  ;;  %v186_v44 = vsub.f32 %v761_v57, %v640_v7 }
  0x46   : > { %v782_v17 = vpop.eup %514  ;;  %v79_v18 = vmul.f32 %v513_v8, %v76_v55  ;;  %534 = vrcp.f32 %v187_v3  ;;  %v209_v26 = vadd.f32 %v640_v7, %v779_v9  ;;  %v208_v53 = vsub.f32 %v779_v9, %v640_v7 }
  0x47   : > { %v517_v21 = vpop.eup %516  ;;  %v343_v22 = vsel %vm325_vm0, %v782_v17, 0.0  ;;  %536 = vrcp.f32 %v217_v5  ;;  %v800_v33 = vadd.f32 %v228_v10, %v618_v0 }
  0x48   : > { %v519_v27 = vpop.eup %518  ;;  %v88_v28 = vadd.f32 1.0, %v79_v18  ;;  %v344_v29 = vadd.f32 %v343_v22, %v342_v13  ;;  %538 = vrcp.f32 %v209_v26  ;;  %v239_v34 = vadd.f32 1.0, %v517_v21  ;;  %v249_v13 = vld [vmem:[%s741_s20 + $0x4] sm:$0x1] }
  0x49   : > { %v795_v31 = vpop.eup %520  ;;  %v797_v32 = vmul.f32 %v519_v27, %v98_v1  ;;  %v255_v37 = vmul.f32 %v584_v14, %v79_v18  ;;  %v231_v48 = vadd.f32 %v640_v7, %v800_v33  ;;  %v259_v5 = vmul.f32 %v580_v15, %v79_v18 }
  0x4a   : > { %v523_v35 = vpop.eup %522  ;;  %v89_v36 = vmul.f32 0.5, %v88_v28  ;;  %v345_v38 = vsel %vm325_vm0, %v795_v31, 0.0  ;;  %540 = vrcp.f32 %v239_v34  ;;  %v285_v18 = vadd.f32 %v249_v13, %v772_v2 }
  0x4b   : > { %v525_v40 = vpop.eup %524  ;;  %v110_v41 = vadd.f32 1.0, %v797_v32  ;;  %v808_v42 = vmul.f32 %v523_v35, %v120_v24  ;;  %v346_v43 = vadd.f32 %v345_v38, %v344_v29  ;;  %542 = vrcp.f32 %v231_v48 }
  0x4c   : > { %v812_v45 = vpop.eup %526  ;;  %v254_v46 = vmul.f32 %v253_v59, %v89_v36  ;;  %v814_v47 = vmul.f32 %v525_v40, %v142_v30 }
  0x4d   : > { %v818_v49 = vpop.eup %528  ;;  %v111_v50 = vmul.f32 0.5, %v110_v41  ;;  %v132_v51 = vadd.f32 1.0, %v808_v42  ;;  %v347_v52 = vsel %vm325_vm0, %v812_v45, 0.0 }
  0x4e   : > { %v531_v54 = vpop.eup %530  ;;  %v256_v55 = vsub.f32 %v254_v46, %v255_v37  ;;  %v154_v56 = vadd.f32 1.0, %v814_v47  ;;  %v348_v57 = vadd.f32 %v347_v52, %v346_v43  ;;  %v349_v59 = vsel %vm325_vm0, %v818_v49, 0.0  ;;  %v250_v37 = vld [vmem:[%s741_s20 + $0x5] sm:$0x1] }
  0x4f   : > { %v828_v60 = vpop.eup %532  ;;  %v262_v61 = vmul.f32 %v261_v19, %v111_v50  ;;  %v133_v62 = vmul.f32 0.5, %v132_v51  ;;  %v830_v63 = vmul.f32 %v531_v54, %v164_v39  ;;  %v293_v48 = vadd.f32 %v250_v37, %v249_v13 }
  0x50   : > { %v535_v1 = vpop.eup %534  ;;  %v257_v3 = vadd.f32 %v584_v14, %v256_v55  ;;  %v263_v8 = vmul.f32 %v256_v55, %v797_v32  ;;  %v350_v9 = vadd.f32 %v349_v59, %v348_v57  ;;  %v155_v10 = vmul.f32 0.5, %v154_v56  ;;  %v251_v56 = vld [vmem:[%s741_s20 + $0x6] sm:$0x1] }
  0x51   : > { %v176_v21 = vadd.f32 1.0, %v830_v63  ;;  %v837_v22 = vmul.f32 %v535_v1, %v186_v44  ;;  %v351_v19 = vsel %vm325_vm0, %v828_v60, 0.0  ;;  %v841_v24 = vpop.eup %536  ;;  %v270_v14 = vmul.f32 %v269_v20, %v133_v62 }
  0x52   : > { %v258_v26 = vmul.f32 %v257_v3, %v89_v36  ;;  %v264_v27 = vsub.f32 %v262_v61, %v263_v8  ;;  %v352_v28 = vadd.f32 %v351_v19, %v350_v9  ;;  %v539_v15 = vpop.eup %538  ;;  %v353_v29 = vsel %vm325_vm0, %v841_v24, 0.0 }
  0x53   : > { %v177_v36 = vmul.f32 0.5, %v176_v21  ;;  %v278_v20 = vmul.f32 %v789_v25, %v155_v10  ;;  %v198_v38 = vadd.f32 1.0, %v837_v22  ;;  %v856_v39 = vmul.f32 %v539_v15, %v208_v53 }
  0x54   : > { %v260_v30 = vsub.f32 %v258_v26, %v259_v5  ;;  %v265_v34 = vadd.f32 %v264_v27, %v256_v55  ;;  %v271_v35 = vmul.f32 %v264_v27, %v808_v42  ;;  %v354_v40 = vadd.f32 %v353_v29, %v352_v28  ;;  %v858_v41 = vpop.eup %540  ;;  %v252_v29 = vld [vmem:[%s741_s20 + $0x7] sm:$0x1]  }
  0x55   : > { %v230_v25 = vsub.f32 %v800_v33, %v640_v7  ;;  %v355_v51 = vsel %vm325_vm0, %v858_v41, 0.0  ;;  %v286_v55 = vmul.f32 %v285_v18, %v177_v36  ;;  %v199_v57 = vmul.f32 0.5, %v198_v38  ;;  %367 = vst [vmem:[#allocation2] sm:$0x1] (%p56_p0), %v252_v29 }
  0x56   : > { %v317_v2 = vmul.f32 %v763_v58, %v260_v30  ;;  %359 = vst [vmem:[%s847_s23] sm:$0x1] %v260_v30  ;;  %v266_v43 = vmul.f32 %v265_v34, %v111_v50  ;;  %v267_v44 = vmul.f32 %v260_v30, %v797_v32  ;;  %v272_v46 = vsub.f32 %v270_v14, %v271_v35  ;;  %v543_v58 = vpop.eup %542 }
  0x57   : > { %v220_v32 = vadd.f32 1.0, %v856_v39  ;;  %v356_v59 = vadd.f32 %v355_v51, %v354_v40  ;;  %v301_v5 = vadd.f32 %v251_v56, %v250_v37  ;;  %v233_v8 = vmul.f32 %v543_v58, %v230_v25 }
  0x58   : > { %v268_v52 = vsub.f32 %v266_v43, %v267_v44  ;;  %v273_v53 = vadd.f32 %v272_v46, %v264_v27  ;;  %v279_v54 = vmul.f32 %v272_v46, %v814_v47  ;;  %v326_v50 = vsel %vm325_vm0, %v317_v2, 0.0 }
  0x59   : > { %v875_v12 = vadd.f32 %v572_v12, %v356_v59   ;;  %v221_v14 = vmul.f32 0.5, %v220_v32  ;;  %v242_v28 = vadd.f32 1.0, %v233_v8  ;;  %v309_v40 = vadd.f32 %v252_v29, %v251_v56 }
  0x5a   : > { %v318_v61 = vmul.f32 %v782_v17, %v268_v52  ;;  %360 = vst [vmem:[%s847_s23 + $0x1] sm:$0x1] %v268_v52  ;;  %v274_v33 = vmul.f32 %v273_v53, %v133_v62  ;;  %v275_v1 = vmul.f32 %v268_v52, %v808_v42  ;;  %v280_v3 = vsub.f32 %v278_v20, %v279_v54 }
  0x5b   : > { %v928_v9 = vmov %v875_v12  ;;  %v294_v17 = vmul.f32 %v293_v48, %v199_v57  ;;  %v302_v20 = vmul.f32 %v301_v5, %v221_v14  ;;  %v243_v38 = vmul.f32 0.5, %v242_v28 }
  0x5c   : > { %v327_v13 = vsel %vm325_vm0, %v318_v61, 0.0  ;;  %v276_v21 = vsub.f32 %v274_v33, %v275_v1  ;;  %v281_v19 = vadd.f32 %v280_v3, %v272_v46  ;;  %v287_v26 = vmul.f32 %v280_v3, %v830_v63  ;;  %371 = vst [vmem:[#allocation6] sm:$0x1] (%p56_p0), %v928_v9 }
  0x5d   : > { %v328_v27 = vadd.f32 %v327_v13, %v326_v50  ;;  %v310_v51 = vmul.f32 %v309_v40, %v243_v38  ;;  %544 = vrcp.f32 (%p56_p0), %v928_v9 }
  0x5e   : > { %v319_v42 = vmul.f32 %v795_v31, %v276_v21  ;;  %361 = vst [vmem:[%s847_s23 + $0x2] sm:$0x1] %v276_v21  ;;  %v282_v62 = vmul.f32 %v281_v19, %v155_v10  ;;  %v283_v15 = vmul.f32 %v276_v21, %v814_v47  ;;  %v288_v18 = vsub.f32 %v286_v55, %v287_v26 }
  0x60   : > { %v329_v12 = vsel %vm325_vm0, %v319_v42, 0.0  ;;  %v284_v30 = vsub.f32 %v282_v62, %v283_v15  ;;  %v289_v34 = vadd.f32 %v288_v18, %v280_v3  ;;  %v295_v35 = vmul.f32 %v288_v18, %v837_v22 }
  0x61   : > { %v330_v37 = vadd.f32 %v329_v12, %v328_v27  ;;  %v929_v12 = vmov %v928_v9 }
  0x62   : > { %v320_v2 = vmul.f32 %v812_v45, %v284_v30  ;;  %362 = vst [vmem:[%s847_s23 + $0x3] sm:$0x1] %v284_v30  ;;  %v290_v31 = vmul.f32 %v289_v34, %v177_v36  ;;  %v291_v10 = vmul.f32 %v284_v30, %v830_v63  ;;  %v296_v47 = vsub.f32 %v294_v17, %v295_v35 }
  0x64   : > { %v331_v43 = vsel %vm325_vm0, %v320_v2, 0.0  ;;  %v292_v44 = vsub.f32 %v290_v31, %v291_v10  ;;  %v297_v46 = vadd.f32 %v296_v47, %v288_v18  ;;  %v303_v48 = vmul.f32 %v296_v47, %v856_v39 }
  0x65   : > { %v332_v25 = vadd.f32 %v331_v43, %v330_v37 }
  0x66   : > { %v321_v52 = vmul.f32 %v818_v49, %v292_v44  ;;  %363 = vst [vmem:[%s847_s23 + $0x4] sm:$0x1] %v292_v44  ;;  %v298_v53 = vmul.f32 %v297_v46, %v199_v57  ;;  %v299_v45 = vmul.f32 %v292_v44, %v837_v22  ;;  %v304_v54 = vsub.f32 %v302_v20, %v303_v48 }
  0x68   : > { %v333_v63 = vsel %vm325_vm0, %v321_v52, 0.0  ;;  %v300_v36 = vsub.f32 %v298_v53, %v299_v45  ;;  %v305_v55 = vadd.f32 %v304_v54, %v296_v47  ;;  %v311_v56 = vmul.f32 %v304_v54, %v233_v8 }
  0x69   : > { %v334_v58 = vadd.f32 %v333_v63, %v332_v25 }
  0x6a   : > { %v322_v50 = vmul.f32 %v828_v60, %v300_v36  ;;  %364 = vst [vmem:[%s847_s23 + $0x5] sm:$0x1] %v300_v36  ;;  %v306_v32 = vmul.f32 %v305_v55, %v221_v14  ;;  %v307_v59 = vmul.f32 %v300_v36, %v856_v39  ;;  %v312_v49 = vsub.f32 %v310_v51, %v311_v56  }
  0x6c   : > { %v335_v57 = vsel %vm325_vm0, %v322_v50, 0.0  ;;  %v308_v61 = vsub.f32 %v306_v32, %v307_v59  ;;  %v313_v22 = vadd.f32 %v312_v49, %v304_v54  ;;  %v932_v14 = vmov %v312_v49  ;;  %368 = vst [vmem:[#allocation3] sm:$0x1] (%p56_p0), %v312_v49 }
  0x6d   : > { %v336_v33 = vadd.f32 %v335_v57, %v334_v58 }
  0x6e   : > { %v323_v1 = vmul.f32 %v841_v24, %v308_v61  ;;  %365 = vst [vmem:[%s847_s23 + $0x6] sm:$0x1] %v308_v61  ;;  %v314_v3 = vmul.f32 %v313_v22, %v243_v38  ;;  %v315_v5 = vmul.f32 %v308_v61, %v233_v8  ;;  %v545_v24 = vpop.eup (%p56_p0), %544 }
  0x70   : > { %v316_v21 = vsub.f32 %v314_v3, %v315_v5   ;;  %v337_v13 = vsel %vm325_vm0, %v323_v1, 0.0 }
  0x71   : > { %v338_v60 = vadd.f32 %v337_v13, %v336_v33  ;;  %v933_v13 = vmov %v252_v29 }
  0x72   : > { %v324_v19 = vmul.f32 %v858_v41, %v316_v21  ;;  %366 = vst [vmem:[%s847_s23 + $0x7] sm:$0x1] %v316_v21  ;;  %v931_v15 = vmov %v316_v21  ;;  %369 = vst [vmem:[#allocation4] sm:$0x1] (%p56_p0), %v316_v21 }
  0x73   :  { %58 = sbr.rel (!%p56_p0) target bundleno = 32 (0x20), region = 59 }
  0x74   : > { %v339_v39 = vsel %vm325_vm0, %v324_v19, 0.0 }
  0x75   : > { %v340_v26 = vadd.f32 %v339_v39, %v338_v60 }
  0x77   : > { %v341_v27 = vadd.f32 %v576_v11, %v340_v26  }
  0x79   : > { %v930_v11 = vmov %v341_v27  ;;  %370 = vst [vmem:[#allocation5] sm:$0x1] (%p56_p0), %v341_v27  ;;  %v376_v41 = vmul.f32 (%p56_p0), %v545_v24, %v341_v27 }
  0x7b   :  { %377 = vst [vmem:[%s925_s2] sm:$0x1] %v376_v41 }

</bundles_post_ra>
